<compile_context>
chip_gen: v6e
topology: v6e:2x2x1
jax: 0.10.0
libtpu: 0.0.40
codegen_flags: <defaults>
</compile_context>

<pallas_src>
import functools

import jax
import jax.numpy as jnp
from jax.experimental import pallas as pl
from jax.experimental.pallas import tpu as pltpu


def mlp_kernel(x_ref, w1_ref, b1_ref, w2_ref, b2_ref, w3_ref, b3_ref, o_ref):
    # fc1 (bf16 operands, f32 accumulate) + bias + ReLU
    h1 = jnp.dot(x_ref[...], w1_ref[...], preferred_element_type=jnp.float32)
    h1 = jnp.maximum(h1 + b1_ref[...], 0.0)
    # (dropout == identity in eval mode)
    # fc2 + bias + ReLU  (re-cast activations to bf16 for the MXU, keep f32 acc)
    h2 = jnp.dot(h1.astype(w2_ref.dtype), w2_ref[...],
                 preferred_element_type=jnp.float32)
    h2 = jnp.maximum(h2 + b2_ref[...], 0.0)
    # (dropout == identity in eval mode)
    # fc3 + bias
    out = jnp.dot(h2.astype(w3_ref.dtype), w3_ref[...],
                  preferred_element_type=jnp.float32)
    o_ref[...] = (out + b3_ref[...]).astype(o_ref.dtype)


def _round_up(v, m):
    return ((v + m - 1) // m) * m


@functools.partial(jax.jit, static_argnames=("block_m",))
def mlp_forward(x, w1, b1, w2, b2, w3, b3, *, block_m=None):
    """x: [N, nfeat]; w*: [in, out] (transpose of PyTorch layout); b*: [1, out]."""
    n, nfeat = x.shape
    h1 = w1.shape[1]
    h2 = w2.shape[1]
    nclass = w3.shape[1]

    # Batch tile: one MXU-full row block; grow for large batches to cut grid steps.
    if block_m is None:
        block_m = min(512, _round_up(n, 128))

    # Lane-dense padding (layout plumbing; zero pads contribute zero to the dots).
    nfeat_p = _round_up(nfeat, 128)
    h2_p = _round_up(h2, 128)
    nclass_p = _round_up(nclass, 128)
    n_p = _round_up(n, block_m)

    cdt = jnp.bfloat16  # MXU-native operand dtype; accumulation stays f32.

    x_p = jnp.zeros((n_p, nfeat_p), cdt).at[:n, :nfeat].set(x.astype(cdt))
    w1_p = jnp.zeros((nfeat_p, h1), cdt).at[:nfeat, :].set(w1.astype(cdt))
    w2_p = jnp.zeros((h1, h2_p), cdt).at[:, :h2].set(w2.astype(cdt))
    w3_p = jnp.zeros((h2_p, nclass_p), cdt).at[:h2, :nclass].set(w3.astype(cdt))
    b1_f = b1.astype(jnp.float32)
    b2_p = jnp.zeros((1, h2_p), jnp.float32).at[:, :h2].set(b2.astype(jnp.float32))
    b3_p = jnp.zeros((1, nclass_p), jnp.float32).at[:, :nclass].set(
        b3.astype(jnp.float32))

    grid = (n_p // block_m,)

    out_p = pl.pallas_call(
        mlp_kernel,
        out_shape=jax.ShapeDtypeStruct((n_p, nclass_p), jnp.float32),
        grid_spec=pltpu.PrefetchScalarGridSpec(
            num_scalar_prefetch=0,
            grid=grid,
            in_specs=[
                pl.BlockSpec((block_m, nfeat_p), lambda i: (i, 0)),  # x tile
                pl.BlockSpec((nfeat_p, h1), lambda i: (0, 0)),       # W1 (resident)
                pl.BlockSpec((1, h1), lambda i: (0, 0)),             # b1
                pl.BlockSpec((h1, h2_p), lambda i: (0, 0)),          # W2 (resident)
                pl.BlockSpec((1, h2_p), lambda i: (0, 0)),           # b2
                pl.BlockSpec((h2_p, nclass_p), lambda i: (0, 0)),    # W3 (resident)
                pl.BlockSpec((1, nclass_p), lambda i: (0, 0)),       # b3
            ],
            out_specs=pl.BlockSpec((block_m, nclass_p), lambda i: (i, 0)),
        ),
        compiler_params=pltpu.CompilerParams(
            dimension_semantics=("parallel",),
        ),
    )(x_p, w1_p, b1_f, w2_p, b2_p, w3_p, b3_p)

    # Strip batch / class padding outside the kernel (lane-dense stores inside).
    return out_p[:n, :nclass].astype(x.dtype)


def init_linear_params(key, fan_in, fan_out, dtype=jnp.float32):
    """Deterministic init mimicking nn.Linear defaults (uniform(-1/sqrt(fan_in), +))."""
    kw, kb = jax.random.split(key)
    bound = 1.0 / (fan_in ** 0.5)
    # stored as [in, out] so the kernel computes x @ W
    w = jax.random.uniform(kw, (fan_in, fan_out), dtype, minval=-bound, maxval=bound)
    b = jax.random.uniform(kb, (1, fan_out), dtype, minval=-bound, maxval=bound)
    return w, b


if __name__ == "__main__":
    nfeat, nclass = 32, 8
    batch = 128
    dtype = jnp.float32

    root = jax.random.PRNGKey(0)
    kx, k1, k2, k3 = jax.random.split(root, 4)

    x = jax.random.normal(kx, (batch, nfeat), dtype)
    w1, b1 = init_linear_params(k1, nfeat, 256, dtype)
    w2, b2 = init_linear_params(k2, 256, 64, dtype)
    w3, b3 = init_linear_params(k3, 64, nclass, dtype)

    out = mlp_forward(x, w1, b1, w2, b2, w3, b3)
    out = jax.block_until_ready(out)
    assert out.shape == (batch, nclass)

    # Reference that mirrors the kernel's numerics (bf16 operands, f32 accumulation).
    bf = jnp.bfloat16
    ref = jnp.dot(x.astype(bf), w1.astype(bf), preferred_element_type=jnp.float32)
    ref = jnp.maximum(ref + b1, 0.0)
    ref = jnp.dot(ref.astype(bf), w2.astype(bf), preferred_element_type=jnp.float32)
    ref = jnp.maximum(ref + b2, 0.0)
    ref = jnp.dot(ref.astype(bf), w3.astype(bf), preferred_element_type=jnp.float32)
    ref = ref + b3
    assert jnp.allclose(out, ref, atol=2e-3, rtol=2e-3), \
        float(jnp.max(jnp.abs(out - ref)))

    # Loose sanity check against the full-f32 math (bf16 quantization error only).
    ref_f32 = jnp.maximum(x @ w1 + b1, 0.0)
    ref_f32 = jnp.maximum(ref_f32 @ w2 + b2, 0.0)
    ref_f32 = ref_f32 @ w3 + b3
    assert jnp.max(jnp.abs(out - ref_f32)) < 5e-2

    print("KERNEL_OK")
</pallas_src>

<mosaic_0001>
module attributes {stable_mosaic.version = 11 : i64} {
  func.func @mlp_kernel(%arg0: i32, %arg1: memref<128x128xbf16, #tpu.memory_space<vmem>>, %arg2: memref<128x256xbf16, #tpu.memory_space<vmem>>, %arg3: memref<1x256xf32, #tpu.memory_space<vmem>>, %arg4: memref<256x128xbf16, #tpu.memory_space<vmem>>, %arg5: memref<1x128xf32, #tpu.memory_space<vmem>>, %arg6: memref<128x128xbf16, #tpu.memory_space<vmem>>, %arg7: memref<1x128xf32, #tpu.memory_space<vmem>>, %arg8: memref<128x128xf32, #tpu.memory_space<vmem>>) attributes {dimension_semantics = [#tpu.dimension_semantics<parallel>], iteration_bounds = array<i64: 1>, scalar_prefetch = 0 : i64, scratch_operands = 0 : i64, tpu.core_type = #tpu.core_type<tc>, window_params = [{transform_indices = @transform_0, window_bounds = array<i64: 128, 128>}, {pipeline_mode = #tpu.pipeline_mode<synchronous>, transform_indices = @transform_1, window_bounds = array<i64: 128, 256>}, {pipeline_mode = #tpu.pipeline_mode<synchronous>, transform_indices = @transform_2, window_bounds = array<i64: 1, 256>}, {pipeline_mode = #tpu.pipeline_mode<synchronous>, transform_indices = @transform_3, window_bounds = array<i64: 256, 128>}, {pipeline_mode = #tpu.pipeline_mode<synchronous>, transform_indices = @transform_4, window_bounds = array<i64: 1, 128>}, {pipeline_mode = #tpu.pipeline_mode<synchronous>, transform_indices = @transform_5, window_bounds = array<i64: 128, 128>}, {pipeline_mode = #tpu.pipeline_mode<synchronous>, transform_indices = @transform_6, window_bounds = array<i64: 1, 128>}, {transform_indices = @transform_7, window_bounds = array<i64: 128, 128>}]} {
    %c0 = arith.constant 0 : index
    %c0_0 = arith.constant 0 : index
    %0 = vector.load %arg1[%c0, %c0_0] : memref<128x128xbf16, #tpu.memory_space<vmem>>, vector<128x128xbf16>
    %c0_1 = arith.constant 0 : index
    %c0_2 = arith.constant 0 : index
    %1 = vector.load %arg2[%c0_1, %c0_2] : memref<128x256xbf16, #tpu.memory_space<vmem>>, vector<128x256xbf16>
    %cst = arith.constant dense<0.000000e+00> : vector<128x256xf32>
    %2 = tpu.matmul %0, %1, %cst {dimension_numbers = #tpu.dot_dimension_numbers<[1], [0], [0], [1], [0, 0, 1, 1], [], []>} : vector<128x128xbf16>, vector<128x256xbf16>, vector<128x256xf32> -> vector<128x256xf32>
    %c0_3 = arith.constant 0 : index
    %c0_4 = arith.constant 0 : index
    %3 = vector.load %arg3[%c0_3, %c0_4] : memref<1x256xf32, #tpu.memory_space<vmem>>, vector<1x256xf32>
    %4 = vector.broadcast %3 : vector<1x256xf32> to vector<128x256xf32>
    %5 = arith.addf %2, %4 : vector<128x256xf32>
    %cst_5 = arith.constant 0.000000e+00 : f32
    %6 = vector.broadcast %cst_5 : f32 to vector<128x256xf32>
    %7 = arith.maximumf %5, %6 : vector<128x256xf32>
    %8 = arith.truncf %7 : vector<128x256xf32> to vector<128x256xbf16>
    %c0_6 = arith.constant 0 : index
    %c0_7 = arith.constant 0 : index
    %9 = vector.load %arg4[%c0_6, %c0_7] : memref<256x128xbf16, #tpu.memory_space<vmem>>, vector<256x128xbf16>
    %cst_8 = arith.constant dense<0.000000e+00> : vector<128x128xf32>
    %10 = tpu.matmul %8, %9, %cst_8 {dimension_numbers = #tpu.dot_dimension_numbers<[1], [0], [0], [1], [0, 0, 1, 1], [], []>} : vector<128x256xbf16>, vector<256x128xbf16>, vector<128x128xf32> -> vector<128x128xf32>
    %c0_9 = arith.constant 0 : index
    %c0_10 = arith.constant 0 : index
    %11 = vector.load %arg5[%c0_9, %c0_10] : memref<1x128xf32, #tpu.memory_space<vmem>>, vector<1x128xf32>
    %12 = vector.broadcast %11 : vector<1x128xf32> to vector<128x128xf32>
    %13 = arith.addf %10, %12 : vector<128x128xf32>
    %cst_11 = arith.constant 0.000000e+00 : f32
    %14 = vector.broadcast %cst_11 : f32 to vector<128x128xf32>
    %15 = arith.maximumf %13, %14 : vector<128x128xf32>
    %16 = arith.truncf %15 : vector<128x128xf32> to vector<128x128xbf16>
    %c0_12 = arith.constant 0 : index
    %c0_13 = arith.constant 0 : index
    %17 = vector.load %arg6[%c0_12, %c0_13] : memref<128x128xbf16, #tpu.memory_space<vmem>>, vector<128x128xbf16>
    %cst_14 = arith.constant dense<0.000000e+00> : vector<128x128xf32>
    %18 = tpu.matmul %16, %17, %cst_14 {dimension_numbers = #tpu.dot_dimension_numbers<[1], [0], [0], [1], [0, 0, 1, 1], [], []>} : vector<128x128xbf16>, vector<128x128xbf16>, vector<128x128xf32> -> vector<128x128xf32>
    %c0_15 = arith.constant 0 : index
    %c0_16 = arith.constant 0 : index
    %19 = vector.load %arg7[%c0_15, %c0_16] : memref<1x128xf32, #tpu.memory_space<vmem>>, vector<1x128xf32>
    %20 = vector.broadcast %19 : vector<1x128xf32> to vector<128x128xf32>
    %21 = arith.addf %18, %20 : vector<128x128xf32>
    %c0_17 = arith.constant 0 : index
    %c0_18 = arith.constant 0 : index
    %22 = vector.load %arg8[%c0_17, %c0_18] : memref<128x128xf32, #tpu.memory_space<vmem>>, vector<128x128xf32>
    tpu.vector_store %arg8[%c0_17, %c0_18], %21 {strides = array<i32>} : memref<128x128xf32, #tpu.memory_space<vmem>>, vector<128x128xf32>,
    return
  }
  func.func @transform_0(%arg0: i32) -> (i32, i32) {
    %c0_i32 = arith.constant 0 : i32
    %c0_i32_0 = arith.constant 0 : i32
    return %arg0, %c0_i32 : i32, i32
  }
  func.func @transform_1(%arg0: i32) -> (i32, i32) {
    %c0_i32 = arith.constant 0 : i32
    %c0_i32_0 = arith.constant 0 : i32
    %c0_i32_1 = arith.constant 0 : i32
    return %c0_i32, %c0_i32_0 : i32, i32
  }
  func.func @transform_2(%arg0: i32) -> (i32, i32) {
    %c0_i32 = arith.constant 0 : i32
    %c0_i32_0 = arith.constant 0 : i32
    %c0_i32_1 = arith.constant 0 : i32
    return %c0_i32, %c0_i32_0 : i32, i32
  }
  func.func @transform_3(%arg0: i32) -> (i32, i32) {
    %c0_i32 = arith.constant 0 : i32
    %c0_i32_0 = arith.constant 0 : i32
    %c0_i32_1 = arith.constant 0 : i32
    return %c0_i32, %c0_i32_0 : i32, i32
  }
  func.func @transform_4(%arg0: i32) -> (i32, i32) {
    %c0_i32 = arith.constant 0 : i32
    %c0_i32_0 = arith.constant 0 : i32
    %c0_i32_1 = arith.constant 0 : i32
    return %c0_i32, %c0_i32_0 : i32, i32
  }
  func.func @transform_5(%arg0: i32) -> (i32, i32) {
    %c0_i32 = arith.constant 0 : i32
    %c0_i32_0 = arith.constant 0 : i32
    %c0_i32_1 = arith.constant 0 : i32
    return %c0_i32, %c0_i32_0 : i32, i32
  }
  func.func @transform_6(%arg0: i32) -> (i32, i32) {
    %c0_i32 = arith.constant 0 : i32
    %c0_i32_0 = arith.constant 0 : i32
    %c0_i32_1 = arith.constant 0 : i32
    return %c0_i32, %c0_i32_0 : i32, i32
  }
  func.func @transform_7(%arg0: i32) -> (i32, i32) {
    %c0_i32 = arith.constant 0 : i32
    %c0_i32_0 = arith.constant 0 : i32
    return %arg0, %c0_i32 : i32, i32
  }
}

</mosaic_0001>

<bundles_post_ra>
// kernel: mlp_forward.1
= control target key start
LH: loop header
LB: loop body
LE: loop exit
PB: predicated region body
PF: predicated region fallthrough
CT: control target
= control target key end

     0   :  { %v1039_v1 = vmov 0   ;;  %v61_v44 = vlaneseq  ;;  %s1343_s1 = inlined_call_operand.vmem [shape: bf16[128,256], index: 1, kind: input, shape index: {}]   ;;  %s1344_s0 = inlined_call_operand.vmem [shape: bf16[128,128], index: 0, kind: input, shape index: {}]   ;;  %s1345_s3 = inlined_call_operand.vmem [shape: bf16[256,128], index: 3, kind: input, shape index: {}]   ;;  %s1346_s5 = inlined_call_operand.vmem [shape: bf16[128,128], index: 5, kind: input, shape index: {}]   ;;  %s1347_s2 = inlined_call_operand.vmem [shape: f32[1,256], index: 2, kind: input, shape index: {}]   ;;  %s1348_s4 = inlined_call_operand.vmem [shape: f32[1,128], index: 4, kind: input, shape index: {}]   ;;  %s1349_s6 = inlined_call_operand.vmem [shape: f32[1,128], index: 6, kind: input, shape index: {}]   ;;  %s1350_s7 = inlined_call_operand.vmem [shape: f32[128,128], index: 7, kind: output, shape index: {}]  }
   0x1   :  { %v983_v0 = vld [vmem:[%s1343_s1 + $0x74] ss:$8 sps:$4 sm:$0xff]   ;;  %231 = vmatprep.mubr.bf16.mxu0 %v1039_v1  ;;  %v985_v2 = vld [vmem:[%s1343_s1 + $0x70] ss:$8 sps:$4 sm:$0xff]   ;;  %v986_v3 = vld [vmem:[%s1343_s1 + $0x64] ss:$8 sps:$4 sm:$0xff]  }
   0x2   :  { %199 = vmatprep.subr.bf16.mxu0 %v983_v0  ;;  %v988_v4 = vld [vmem:[%s1343_s1 + $0x60] ss:$8 sps:$4 sm:$0xff]   ;;  %v989_v5 = vld [vmem:[%s1343_s1 + $0x54] ss:$8 sps:$4 sm:$0xff]   ;;  %v991_v6 = vld [vmem:[%s1343_s1 + $0x50] ss:$8 sps:$4 sm:$0xff]  }
   0x3   :  { %200 = vmatpush1.bf16.msra.mxu0 %v985_v2  ;;  %v992_v7 = vld [vmem:[%s1343_s1 + $0x44] ss:$8 sps:$4 sm:$0xff]   ;;  %v994_v8 = vld [vmem:[%s1343_s1 + $0x40] ss:$8 sps:$4 sm:$0xff]   ;;  %v995_v9 = vld [vmem:[%s1343_s1 + $0x34] ss:$8 sps:$4 sm:$0xff]  }
   0x4   :  { %201 = vmatprep.subr.bf16.mxu0 %v986_v3  ;;  %v997_v10 = vld [vmem:[%s1343_s1 + $0x30] ss:$8 sps:$4 sm:$0xff]   ;;  %v998_v11 = vld [vmem:[%s1343_s1 + $0x24] ss:$8 sps:$4 sm:$0xff]   ;;  %v1000_v12 = vld [vmem:[%s1343_s1 + $0x20] ss:$8 sps:$4 sm:$0xff]  }
   0x5   :  { %v1001_v13 = vld [vmem:[%s1343_s1 + $0x14] ss:$8 sps:$4 sm:$0xff]   ;;  %v1003_v16 = vld [vmem:[%s1343_s1 + $0x10] ss:$8 sps:$4 sm:$0xff]   ;;  %v1019_v19 = vld [vmem:[%s1345_s3 + $0x68] sm:$0xff]   ;;  %v62_v45 = vshrl.u32 %v61_v44, 7 }
   0x6   :  { %v1015_v14 = vld [vmem:[%s1345_s3 + $0x78] sm:$0xff]   ;;  %v1017_v17 = vld [vmem:[%s1345_s3 + $0x70] sm:$0xff]   ;;  %v1004_v20 = vld [vmem:[%s1343_s1 + $0x4] ss:$8 sps:$4 sm:$0xff]  }
   0x7   :  { %202 = vmatpush1.bf16.msra.mxu0 %v988_v4  ;;  %v1016_v15 = vld [vmem:[%s1345_s3 + $0x38] sm:$0xff]   ;;  %854 = vmatprep.subr.bf16.mxu1 %v1015_v14  ;;  %v1018_v18 = vld [vmem:[%s1345_s3 + $0x30] sm:$0xff]   ;;  %v1006_v21 = vld [vmem:[%s1343_s1] ss:$8 sps:$4 sm:$0xff]   ;;  %v67_v46 = vsub.s32 1, %v62_v45  ;;  %v63_v47 = vsub.s32 0, %v62_v45 }
   0x8   :  { %203 = vmatprep.subr.bf16.mxu0 %v989_v5  ;;  %855 = vmatpush3.bf16.msra.mxu1 %v1016_v15  ;;  %v1020_v22 = vld [vmem:[%s1345_s3 + $0x28] sm:$0xff]   ;;  %v1021_v23 = vld [vmem:[%s1345_s3 + $0x60] sm:$0xff]   ;;  %v1023_v26 = vld [vmem:[%s1345_s3 + $0x58] sm:$0xff]  }
   0x9   :  { %856 = vmatprep.subr.bf16.mxu1 %v1017_v17  ;;  %v1007_v24 = vld [vmem:[%s1344_s0] sm:$0xff]   ;;  %v1024_v27 = vld [vmem:[%s1345_s3 + $0x18] sm:$0xff]   ;;  %v1008_v28 = vld [vmem:[%s1344_s0 + $0x8] sm:$0xff]  }
   0xa   :  { %v1022_v25 = vld [vmem:[%s1345_s3 + $0x20] sm:$0xff]   ;;  %v1009_v29 = vld [vmem:[%s1344_s0 + $0x10] sm:$0xff]   ;;  %v1010_v30 = vld [vmem:[%s1344_s0 + $0x18] sm:$0xff]  }
   0xb   :  { %204 = vmatpush1.bf16.msra.mxu0 %v991_v6  ;;  %v1011_v31 = vld [vmem:[%s1344_s0 + $0x20] sm:$0xff]   ;;  %v1012_v32 = vld [vmem:[%s1344_s0 + $0x28] sm:$0xff]   ;;  %v1013_v33 = vld [vmem:[%s1344_s0 + $0x30] sm:$0xff]  }
   0xc   :  { %205 = vmatprep.subr.bf16.mxu0 %v992_v7  ;;  %857 = vmatpush3.bf16.msra.mxu1 %v1018_v18  ;;  %v1014_v34 = vld [vmem:[%s1344_s0 + $0x38] sm:$0xff]   ;;  %v1025_v35 = vld [vmem:[%s1345_s3 + $0x50] sm:$0xff]   ;;  %v1027_v37 = vld [vmem:[%s1345_s3 + $0x48] sm:$0xff]  }
   0xd   :  { %858 = vmatprep.subr.bf16.mxu1 %v1019_v19  ;;  %v1026_v36 = vld [vmem:[%s1345_s3 + $0x10] sm:$0xff]   ;;  %v1028_v38 = vld [vmem:[%s1345_s3 + $0x8] sm:$0xff]   ;;  %v1029_v39 = vld [vmem:[%s1345_s3 + $0x40] sm:$0xff]  }
   0xe   :  { %v1030_v40 = vld [vmem:[%s1345_s3] sm:$0xff]   ;;  %v1031_v41 = vld [vmem:[%s1346_s5 + $0x38] sm:$0xff]   ;;  %v1032_v42 = vld [vmem:[%s1346_s5 + $0x30] sm:$0xff]  }
   0xf   :  { %206 = vmatpush1.bf16.msra.mxu0 %v994_v8  ;;  %v1033_v43 = vld [vmem:[%s1346_s5 + $0x28] sm:$0xff]   ;;  %v59_v48 = vld [vmem:[%s1347_s2] sm:$0x3] }
  0x10   :  { %207 = vmatprep.subr.bf16.mxu0 %v995_v9  ;;  %859 = vmatpush3.bf16.msra.mxu1 %v1020_v22  ;;  %v1220_v50 = vrot.slane %v59_v48, %v67_v46  ;;  %v1222_v51 = vrot.slane %v59_v48, %v63_v47 }
  0x11   :  { %860 = vmatprep.subr.bf16.mxu1 %v1021_v23 }
  0x13   :  { %208 = vmatpush1.bf16.msra.mxu0 %v997_v10 }
  0x14   :  { %209 = vmatprep.subr.bf16.mxu0 %v998_v11  ;;  %861 = vmatpush3.bf16.msra.mxu1 %v1022_v25 }
  0x15   :  { %862 = vmatprep.subr.bf16.mxu1 %v1023_v26 }
  0x17   :  { %210 = vmatpush1.bf16.msra.mxu0 %v1000_v12 }
  0x18   :  { %211 = vmatprep.subr.bf16.mxu0 %v1001_v13  ;;  %863 = vmatpush3.bf16.msra.mxu1 %v1024_v27 }
  0x19   :  { %864 = vmatprep.subr.bf16.mxu1 %v1025_v35 }
  0x1b   :  { %212 = vmatpush1.bf16.msra.mxu0 %v1003_v16 }
  0x1c   :  { %213 = vmatprep.subr.bf16.mxu0 %v1004_v20  ;;  %865 = vmatpush3.bf16.msra.mxu1 %v1026_v36 }
  0x1d   :  { %866 = vmatprep.subr.bf16.mxu1 %v1027_v37 }
  0x1f   :  { %214 = vmatpush1.bf16.msra.mxu0 %v1006_v21 }
  0x20   :  { %867 = vmatpush3.bf16.msra.mxu1 %v1028_v38  ;;  %934 = vmatprep.subr.bf16.mxu0 %v1031_v41 }
  0x21   :  { %868 = vmatprep.subr.bf16.mxu1 %v1029_v39 }
  0x22   :  { %232 = vmatmul.mubr.bf16.vlgmr.msra.gmra.mxu0 %v1007_v24 }
  0x23   :  { %241 = vmatprep.mubr.bf16.mxu0 %v1039_v1  ;;  %935 = vmatpush3.bf16.msra.mxu0 %v1031_v41 }
  0x24   :  { %869 = vmatpush3.bf16.msra.mxu1 %v1030_v40  ;;  %936 = vmatprep.subr.bf16.mxu0 %v1032_v42 }
  0x25   :  { %966 = vmatprep.subr.bf16.mxu1 %v1031_v41 }
  0x27   :  { %937 = vmatpush3.bf16.msra.mxu0 %v1032_v42 }
  0x28   :  { %938 = vmatprep.subr.bf16.mxu0 %v1033_v43 }
  0x2a   :  { %242 = vmatmul.mubr.bf16.gmra.mxu0 %v1008_v28 }
  0x2b   :  { %251 = vmatprep.mubr.bf16.mxu0 %v1039_v1  ;;  %939 = vmatpush3.bf16.msra.mxu0 %v1033_v43 }
  0x32   :  { %252 = vmatmul.mubr.bf16.gmra.mxu0 %v1009_v29 }
  0x33   :  { %261 = vmatprep.mubr.bf16.mxu0 %v1039_v1 }
  0x3a   :  { %262 = vmatmul.mubr.bf16.gmra.mxu0 %v1010_v30 }
  0x3b   :  { %271 = vmatprep.mubr.bf16.mxu0 %v1039_v1 }
  0x42   :  { %272 = vmatmul.mubr.bf16.gmra.mxu0 %v1011_v31 }
  0x43   :  { %281 = vmatprep.mubr.bf16.mxu0 %v1039_v1 }
  0x4a   :  { %282 = vmatmul.mubr.bf16.gmra.mxu0 %v1012_v32 }
  0x4b   :  { %291 = vmatprep.mubr.bf16.mxu0 %v1039_v1 }
  0x52   :  { %292 = vmatmul.mubr.bf16.gmra.mxu0 %v1013_v33 }
  0x53   :  { %301 = vmatprep.mubr.bf16.mxu0 %v1039_v1 }
  0x5a   :  { %302 = vmatmul.mubr.bf16.gmra.mxu0 %v1014_v34 }
  0xe2   :  { %v233_v49 = vpop.f32.mrf.mxu0 }
  0xe3   :  { %v234_v56 = vadd.f32 %v233_v49, %v1222_v51 }
  0xe4   :  { %v235_v52 = vpop.f32.mrf.mxu0 }
  0xe5   :  { %v236_v54 = vadd.f32 %v235_v52, %v1220_v50  ;;  %v312_v63 = vmax.f32 %v234_v56, 0.0 }
  0xe6   :  { %v237_v53 = vpop.f32.mrf.mxu0 }
  0xe7   :  { %v238_v55 = vadd.f32 %v237_v53, %v1222_v51  ;;  %v313_v61 = vmax.f32 %v236_v54, 0.0 }
  0xe8   :  { %v239_v57 = vpop.f32.mrf.mxu0 }
  0xe9   :  { %v240_v58 = vadd.f32 %v239_v57, %v1220_v50  ;;  %v314_v59 = vmax.f32 %v238_v55, 0.0 }
  0xea   :  { %v243_v60 = vpop.f32.mrf.mxu0 }
  0xeb   :  { %v315_v62 = vmax.f32 %v240_v58, 0.0  ;;  %v344_v2 = vpack.c.bf16 %v314_v59, %v312_v63  ;;  %v244_v6 = vadd.f32 %v243_v60, %v1222_v51 }
  0xec   :  { %v245_v0 = vpop.f32.mrf.mxu0 }
  0xed   :  { %v345_v1 = vpack.c.bf16 %v315_v62, %v313_v61  ;;  %v246_v4 = vadd.f32 %v245_v0, %v1220_v50  ;;  %v316_v13 = vmax.f32 %v244_v6, 0.0 }
  0xee   :  { %v247_v3 = vpop.f32.mrf.mxu0 }
  0xef   :  { %v248_v5 = vadd.f32 %v247_v3, %v1222_v51  ;;  %527 = vmatprep.mubr.bf16.mxu1 %v345_v1  ;;  %v317_v11 = vmax.f32 %v246_v4, 0.0 }
  0xf0   :  { %v249_v7 = vpop.f32.mrf.mxu0  ;;  %528 = vmatmul.mubr.bf16.vlgmr.msra.gmra.mxu1 %v344_v2 }
  0xf1   :  { %v250_v8 = vadd.f32 %v249_v7, %v1220_v50  ;;  %974 = vmatpush3.bf16.msra.mxu1 %v1031_v41  ;;  %v318_v9 = vmax.f32 %v248_v5, 0.0 }
  0xf2   :  { %v253_v10 = vpop.f32.mrf.mxu0  ;;  %967 = vmatprep.subr.bf16.mxu1 %v1032_v42 }
  0xf3   :  { %v319_v12 = vmax.f32 %v250_v8, 0.0  ;;  %v346_v16 = vpack.c.bf16 %v318_v9, %v316_v13  ;;  %v254_v20 = vadd.f32 %v253_v10, %v1222_v51 }
  0xf4   :  { %v255_v14 = vpop.f32.mrf.mxu0 }
  0xf5   :  { %v347_v15 = vpack.c.bf16 %v319_v12, %v317_v11  ;;  %975 = vmatpush3.bf16.msra.mxu1 %v1032_v42  ;;  %v256_v18 = vadd.f32 %v255_v14, %v1220_v50  ;;  %v320_v27 = vmax.f32 %v254_v20, 0.0 }
  0xf6   :  { %v257_v17 = vpop.f32.mrf.mxu0  ;;  %968 = vmatprep.subr.bf16.mxu1 %v1033_v43 }
  0xf7   :  { %v258_v19 = vadd.f32 %v257_v17, %v1222_v51  ;;  %535 = vmatprep.mubr.bf16.mxu1 %v347_v15  ;;  %v321_v25 = vmax.f32 %v256_v18, 0.0 }
  0xf8   :  { %v259_v21 = vpop.f32.mrf.mxu0  ;;  %536 = vmatmul.mubr.bf16.gmra.mxu1 %v346_v16 }
  0xf9   :  { %v260_v22 = vadd.f32 %v259_v21, %v1220_v50  ;;  %976 = vmatpush3.bf16.msra.mxu1 %v1033_v43  ;;  %v322_v23 = vmax.f32 %v258_v19, 0.0 }
  0xfa   :  { %v263_v24 = vpop.f32.mrf.mxu0 }
  0xfb   :  { %v323_v26 = vmax.f32 %v260_v22, 0.0  ;;  %v348_v30 = vpack.c.bf16 %v322_v23, %v320_v27  ;;  %v264_v34 = vadd.f32 %v263_v24, %v1222_v51 }
  0xfc   :  { %v265_v28 = vpop.f32.mrf.mxu0 }
  0xfd   :  { %v349_v29 = vpack.c.bf16 %v323_v26, %v321_v25  ;;  %v266_v32 = vadd.f32 %v265_v28, %v1220_v50  ;;  %v324_v41 = vmax.f32 %v264_v34, 0.0 }
  0xfe   :  { %v267_v31 = vpop.f32.mrf.mxu0 }
  0xff   :  { %v268_v33 = vadd.f32 %v267_v31, %v1222_v51  ;;  %543 = vmatprep.mubr.bf16.mxu1 %v349_v29  ;;  %v325_v39 = vmax.f32 %v266_v32, 0.0 }
 0x100   :  { %v269_v35 = vpop.f32.mrf.mxu0  ;;  %544 = vmatmul.mubr.bf16.gmra.mxu1 %v348_v30 }
 0x101   :  { %v270_v36 = vadd.f32 %v269_v35, %v1220_v50  ;;  %v326_v37 = vmax.f32 %v268_v33, 0.0 }
 0x102   :  { %v273_v38 = vpop.f32.mrf.mxu0 }
 0x103   :  { %v327_v40 = vmax.f32 %v270_v36, 0.0  ;;  %v350_v44 = vpack.c.bf16 %v326_v37, %v324_v41  ;;  %v274_v48 = vadd.f32 %v273_v38, %v1222_v51  ;;  %v1034_v37 = vld [vmem:[%s1346_s5 + $0x20] sm:$0xff]   ;;  %v1037_v38 = vld [vmem:[%s1346_s5 + $0x8] sm:$0xff]  }
 0x104   :  { %v275_v42 = vpop.f32.mrf.mxu0  ;;  %940 = vmatprep.subr.bf16.mxu0 %v1034_v37  ;;  %969 = vmatprep.subr.bf16.mxu1 %v1034_v37 }
 0x105   :  { %v351_v43 = vpack.c.bf16 %v327_v40, %v325_v39  ;;  %v276_v46 = vadd.f32 %v275_v42, %v1220_v50  ;;  %v328_v57 = vmax.f32 %v274_v48, 0.0  ;;  %941 = vmatpush3.bf16.msra.mxu0 %v1034_v37  ;;  %977 = vmatpush3.bf16.msra.mxu1 %v1034_v37  ;;  %v1038_v39 = vld [vmem:[%s1346_s5] sm:$0xff]  }
 0x106   :  { %v277_v45 = vpop.f32.mrf.mxu0 }
 0x107   :  { %v278_v47 = vadd.f32 %v277_v45, %v1222_v51  ;;  %551 = vmatprep.mubr.bf16.mxu1 %v351_v43  ;;  %v329_v55 = vmax.f32 %v276_v46, 0.0  ;;  %v1274_v43 = vld [vmem:[%s1348_s4] ss:$0 sm:$0xff] }
 0x108   :  { %v279_v49 = vpop.f32.mrf.mxu0  ;;  %552 = vmatmul.mubr.bf16.gmra.mxu1 %v350_v44 }
 0x109   :  { %v280_v52 = vadd.f32 %v279_v49, %v1220_v50  ;;  %v330_v53 = vmax.f32 %v278_v47, 0.0 }
 0x10a   :  { %v283_v54 = vpop.f32.mrf.mxu0 }
 0x10b   :  { %v331_v56 = vmax.f32 %v280_v52, 0.0  ;;  %v352_v60 = vpack.c.bf16 %v330_v53, %v328_v57  ;;  %v284_v0 = vadd.f32 %v283_v54, %v1222_v51 }
 0x10c   :  { %v285_v58 = vpop.f32.mrf.mxu0 }
 0x10d   :  { %v353_v59 = vpack.c.bf16 %v331_v56, %v329_v55  ;;  %v286_v62 = vadd.f32 %v285_v58, %v1220_v50  ;;  %v332_v7 = vmax.f32 %v284_v0, 0.0 }
 0x10e   :  { %v287_v61 = vpop.f32.mrf.mxu0 }
 0x10f   :  { %v288_v63 = vadd.f32 %v287_v61, %v1222_v51  ;;  %559 = vmatprep.mubr.bf16.mxu1 %v353_v59  ;;  %v333_v5 = vmax.f32 %v286_v62, 0.0 }
 0x110   :  { %v289_v1 = vpop.f32.mrf.mxu0  ;;  %560 = vmatmul.mubr.bf16.gmra.mxu1 %v352_v60 }
 0x111   :  { %v290_v2 = vadd.f32 %v289_v1, %v1220_v50  ;;  %v334_v3 = vmax.f32 %v288_v63, 0.0 }
 0x112   :  { %v293_v4 = vpop.f32.mrf.mxu0 }
 0x113   :  { %v335_v6 = vmax.f32 %v290_v2, 0.0  ;;  %v354_v10 = vpack.c.bf16 %v334_v3, %v332_v7  ;;  %v294_v14 = vadd.f32 %v293_v4, %v1222_v51 }
 0x114   :  { %v295_v8 = vpop.f32.mrf.mxu0 }
 0x115   :  { %v355_v9 = vpack.c.bf16 %v335_v6, %v333_v5  ;;  %v296_v12 = vadd.f32 %v295_v8, %v1220_v50  ;;  %v336_v21 = vmax.f32 %v294_v14, 0.0 }
 0x116   :  { %v297_v11 = vpop.f32.mrf.mxu0 }
 0x117   :  { %v298_v13 = vadd.f32 %v297_v11, %v1222_v51  ;;  %567 = vmatprep.mubr.bf16.mxu1 %v355_v9  ;;  %v337_v19 = vmax.f32 %v296_v12, 0.0 }
 0x118   :  { %v299_v15 = vpop.f32.mrf.mxu0  ;;  %568 = vmatmul.mubr.bf16.gmra.mxu1 %v354_v10 }
 0x119   :  { %v300_v16 = vadd.f32 %v299_v15, %v1220_v50  ;;  %v338_v17 = vmax.f32 %v298_v13, 0.0 }
 0x11a   :  { %v303_v18 = vpop.f32.mrf.mxu0 }
 0x11b   :  { %v339_v20 = vmax.f32 %v300_v16, 0.0  ;;  %v356_v24 = vpack.c.bf16 %v338_v17, %v336_v21  ;;  %v304_v28 = vadd.f32 %v303_v18, %v1222_v51 }
 0x11c   :  { %v305_v22 = vpop.f32.mrf.mxu0 }
 0x11d   :  { %v357_v23 = vpack.c.bf16 %v339_v20, %v337_v19  ;;  %v306_v26 = vadd.f32 %v305_v22, %v1220_v50  ;;  %v340_v34 = vmax.f32 %v304_v28, 0.0 }
 0x11e   :  { %v307_v25 = vpop.f32.mrf.mxu0 }
 0x11f   :  { %v308_v27 = vadd.f32 %v307_v25, %v1222_v51  ;;  %575 = vmatprep.mubr.bf16.mxu1 %v357_v23  ;;  %v341_v32 = vmax.f32 %v306_v26, 0.0  ;;  %v1036_v51 = vld [vmem:[%s1346_s5 + $0x10] sm:$0xff]  }
 0x120   :  { %v309_v29 = vpop.f32.mrf.mxu0  ;;  %576 = vmatmul.mubr.bf16.gmra.mxu1 %v356_v24 }
 0x121   :  { %v310_v30 = vadd.f32 %v309_v29, %v1220_v50  ;;  %v342_v31 = vmax.f32 %v308_v27, 0.0  ;;  %v1035_v50 = vld [vmem:[%s1346_s5 + $0x18] sm:$0xff]  }
 0x122   :  { %942 = vmatprep.subr.bf16.mxu0 %v1035_v50  ;;  %970 = vmatprep.subr.bf16.mxu1 %v1035_v50 }
 0x123   :  { %v343_v33 = vmax.f32 %v310_v30, 0.0  ;;  %v358_v36 = vpack.c.bf16 %v342_v31, %v340_v34  ;;  %943 = vmatpush3.bf16.msra.mxu0 %v1035_v50  ;;  %978 = vmatpush3.bf16.msra.mxu1 %v1035_v50 }
 0x124   :  { %944 = vmatprep.subr.bf16.mxu0 %v1036_v51  ;;  %971 = vmatprep.subr.bf16.mxu1 %v1036_v51 }
 0x125   :  { %v359_v35 = vpack.c.bf16 %v343_v33, %v341_v32 }
 0x127   :  { %583 = vmatprep.mubr.bf16.mxu1 %v359_v35  ;;  %945 = vmatpush3.bf16.msra.mxu0 %v1036_v51 }
 0x128   :  { %584 = vmatmul.mubr.bf16.gmra.mxu1 %v358_v36  ;;  %946 = vmatprep.subr.bf16.mxu0 %v1037_v38 }
 0x129   :  { %979 = vmatpush3.bf16.msra.mxu1 %v1036_v51 }
 0x12a   :  { %972 = vmatprep.subr.bf16.mxu1 %v1037_v38 }
 0x12b   :  { %947 = vmatpush3.bf16.msra.mxu0 %v1037_v38 }
 0x12c   :  { %948 = vmatprep.subr.bf16.mxu0 %v1038_v39 }
 0x12d   :  { %980 = vmatpush3.bf16.msra.mxu1 %v1037_v38 }
 0x12e   :  { %973 = vmatprep.subr.bf16.mxu1 %v1038_v39 }
 0x12f   :  { %949 = vmatpush3.bf16.msra.mxu0 %v1038_v39 }
 0x131   :  { %981 = vmatpush3.bf16.msra.mxu1 %v1038_v39 }
 0x1b0   :  { %v870_v40 = vpop.f32.mrf.mxu1 }
 0x1b2   :  { %v871_v41 = vpop.f32.mrf.mxu1 }
 0x1b3   :  { %v872_v42 = vadd.f32 %v871_v41, %v870_v40 }
 0x1b4   :  { %v873_v44 = vpop.f32.mrf.mxu1 }
 0x1b5   :  { %v530_v46 = vadd.f32 %v872_v42, %v1274_v43 }
 0x1b6   :  { %v874_v45 = vpop.f32.mrf.mxu1 }
 0x1b7   :  { %v875_v47 = vadd.f32 %v874_v45, %v873_v44  ;;  %v592_v53 = vmax.f32 %v530_v46, 0.0 }
 0x1b8   :  { %v876_v48 = vpop.f32.mrf.mxu1 }
 0x1b9   :  { %v533_v49 = vadd.f32 %v875_v47, %v1274_v43 }
 0x1ba   :  { %v877_v52 = vpop.f32.mrf.mxu1 }
 0x1bb   :  { %v593_v54 = vmax.f32 %v533_v49, 0.0  ;;  %v878_v55 = vadd.f32 %v877_v52, %v876_v48 }
 0x1bc   :  { %v879_v56 = vpop.f32.mrf.mxu1 }
 0x1bd   :  { %v608_v57 = vpack.c.bf16 %v593_v54, %v592_v53  ;;  %v538_v59 = vadd.f32 %v878_v55, %v1274_v43 }
 0x1be   :  { %v880_v58 = vpop.f32.mrf.mxu1 }
 0x1bf   :  { %v881_v60 = vadd.f32 %v880_v58, %v879_v56  ;;  %950 = vmatprep.mubr.bf16.mxu0 %v608_v57  ;;  %v594_v0 = vmax.f32 %v538_v59, 0.0 }
 0x1c0   :  { %v882_v61 = vpop.f32.mrf.mxu1 }
 0x1c1   :  { %v541_v62 = vadd.f32 %v881_v60, %v1274_v43 }
 0x1c2   :  { %v883_v63 = vpop.f32.mrf.mxu1 }
 0x1c3   :  { %v595_v1 = vmax.f32 %v541_v62, 0.0  ;;  %v884_v2 = vadd.f32 %v883_v63, %v882_v61 }
 0x1c4   :  { %v885_v3 = vpop.f32.mrf.mxu1 }
 0x1c5   :  { %v609_v4 = vpack.c.bf16 %v595_v1, %v594_v0  ;;  %v546_v6 = vadd.f32 %v884_v2, %v1274_v43 }
 0x1c6   :  { %v886_v5 = vpop.f32.mrf.mxu1 }
 0x1c7   :  { %v887_v7 = vadd.f32 %v886_v5, %v885_v3  ;;  %951 = vmatmul.mubr.bf16.vlgmr.msra.gmra.mxu0 %v609_v4  ;;  %v596_v11 = vmax.f32 %v546_v6, 0.0  ;;  %v845_v4 = vld [vmem:[%s1349_s6] ss:$0 sm:$0xff] }
 0x1c8   :  { %v888_v8 = vpop.f32.mrf.mxu1 }
 0x1c9   :  { %v549_v9 = vadd.f32 %v887_v7, %v1274_v43 }
 0x1ca   :  { %v889_v10 = vpop.f32.mrf.mxu1 }
 0x1cb   :  { %v597_v12 = vmax.f32 %v549_v9, 0.0  ;;  %v890_v13 = vadd.f32 %v889_v10, %v888_v8 }
 0x1cc   :  { %v891_v14 = vpop.f32.mrf.mxu1 }
 0x1cd   :  { %v610_v15 = vpack.c.bf16 %v597_v12, %v596_v11  ;;  %v554_v17 = vadd.f32 %v890_v13, %v1274_v43 }
 0x1ce   :  { %v892_v16 = vpop.f32.mrf.mxu1 }
 0x1cf   :  { %v893_v18 = vadd.f32 %v892_v16, %v891_v14  ;;  %954 = vmatprep.mubr.bf16.mxu0 %v610_v15  ;;  %v598_v22 = vmax.f32 %v554_v17, 0.0 }
 0x1d0   :  { %v894_v19 = vpop.f32.mrf.mxu1 }
 0x1d1   :  { %v557_v20 = vadd.f32 %v893_v18, %v1274_v43 }
 0x1d2   :  { %v895_v21 = vpop.f32.mrf.mxu1 }
 0x1d3   :  { %v599_v23 = vmax.f32 %v557_v20, 0.0  ;;  %v896_v24 = vadd.f32 %v895_v21, %v894_v19 }
 0x1d4   :  { %v897_v25 = vpop.f32.mrf.mxu1 }
 0x1d5   :  { %v611_v26 = vpack.c.bf16 %v599_v23, %v598_v22  ;;  %v562_v28 = vadd.f32 %v896_v24, %v1274_v43 }
 0x1d6   :  { %v898_v27 = vpop.f32.mrf.mxu1 }
 0x1d7   :  { %v899_v29 = vadd.f32 %v898_v27, %v897_v25  ;;  %955 = vmatmul.mubr.bf16.gmra.mxu0 %v611_v26  ;;  %v600_v33 = vmax.f32 %v562_v28, 0.0 }
 0x1d8   :  { %v900_v30 = vpop.f32.mrf.mxu1 }
 0x1d9   :  { %v565_v31 = vadd.f32 %v899_v29, %v1274_v43 }
 0x1da   :  { %v901_v32 = vpop.f32.mrf.mxu1 }
 0x1db   :  { %v601_v34 = vmax.f32 %v565_v31, 0.0  ;;  %v902_v35 = vadd.f32 %v901_v32, %v900_v30 }
 0x1dc   :  { %v903_v36 = vpop.f32.mrf.mxu1 }
 0x1dd   :  { %v612_v37 = vpack.c.bf16 %v601_v34, %v600_v33  ;;  %v570_v51 = vadd.f32 %v902_v35, %v1274_v43 }
 0x1de   :  { %v904_v50 = vpop.f32.mrf.mxu1 }
 0x1df   :  { %v905_v38 = vadd.f32 %v904_v50, %v903_v36  ;;  %958 = vmatprep.mubr.bf16.mxu1 %v612_v37  ;;  %v602_v42 = vmax.f32 %v570_v51, 0.0 }
 0x1e0   :  { %v906_v39 = vpop.f32.mrf.mxu1 }
 0x1e1   :  { %v573_v40 = vadd.f32 %v905_v38, %v1274_v43 }
 0x1e2   :  { %v907_v41 = vpop.f32.mrf.mxu1 }
 0x1e3   :  { %v603_v44 = vmax.f32 %v573_v40, 0.0  ;;  %v908_v45 = vadd.f32 %v907_v41, %v906_v39 }
 0x1e4   :  { %v909_v46 = vpop.f32.mrf.mxu1 }
 0x1e5   :  { %v613_v47 = vpack.c.bf16 %v603_v44, %v602_v42  ;;  %v578_v49 = vadd.f32 %v908_v45, %v1274_v43 }
 0x1e6   :  { %v910_v48 = vpop.f32.mrf.mxu1 }
 0x1e7   :  { %v911_v52 = vadd.f32 %v910_v48, %v909_v46  ;;  %959 = vmatmul.mubr.bf16.vlgmr.msra.gmra.mxu1 %v613_v47  ;;  %v604_v56 = vmax.f32 %v578_v49, 0.0 }
 0x1e8   :  { %v912_v53 = vpop.f32.mrf.mxu1 }
 0x1e9   :  { %v581_v54 = vadd.f32 %v911_v52, %v1274_v43 }
 0x1ea   :  { %v913_v55 = vpop.f32.mrf.mxu1 }
 0x1eb   :  { %v605_v57 = vmax.f32 %v581_v54, 0.0  ;;  %v914_v58 = vadd.f32 %v913_v55, %v912_v53 }
 0x1ec   :  { %v915_v59 = vpop.f32.mrf.mxu1 }
 0x1ed   :  { %v614_v60 = vpack.c.bf16 %v605_v57, %v604_v56  ;;  %v586_v62 = vadd.f32 %v914_v58, %v1274_v43 }
 0x1ee   :  { %v916_v61 = vpop.f32.mrf.mxu1 }
 0x1ef   :  { %v917_v63 = vadd.f32 %v916_v61, %v915_v59  ;;  %962 = vmatprep.mubr.bf16.mxu1 %v614_v60  ;;  %v606_v1 = vmax.f32 %v586_v62, 0.0 }
 0x1f1   :  { %v589_v0 = vadd.f32 %v917_v63, %v1274_v43 }
 0x1f3   :  { %v607_v2 = vmax.f32 %v589_v0, 0.0 }
 0x1f5   :  { %v615_v3 = vpack.c.bf16 %v607_v2, %v606_v1 }
 0x1f7   :  { %963 = vmatmul.mubr.bf16.gmra.mxu1 %v615_v3 }
 0x287   :  { %v952_v5 = vpop.f32.mrf.mxu0 }
 0x288   :  { %v730_v6 = vadd.f32 %v952_v5, %v845_v4 }
 0x289   :  { %v721_v7 = vpop.f32.mrf.mxu0 }
 0x28a   :  { %786 = vst [vmem:[%s1350_s7 + $0x10] sm:$0xff] %v730_v6  ;;  %v722_v8 = vadd.f32 %v845_v4, %v721_v7 }
 0x28b   :  { %v953_v9 = vpop.f32.mrf.mxu0 }
 0x28c   :  { %784 = vst [vmem:[%s1350_s7] sm:$0xff] %v722_v8  ;;  %v733_v43 = vadd.f32 %v953_v9, %v845_v4 }
 0x28d   :  { %v724_v10 = vpop.f32.mrf.mxu0 }
 0x28e   :  { %787 = vst [vmem:[%s1350_s7 + $0x18] sm:$0xff] %v733_v43  ;;  %v725_v11 = vadd.f32 %v845_v4, %v724_v10 }
 0x290   :  { %785 = vst [vmem:[%s1350_s7 + $0x8] sm:$0xff] %v725_v11 }
 0x297   :  { %v956_v12 = vpop.f32.mrf.mxu0 }
 0x298   :  { %v746_v13 = vadd.f32 %v956_v12, %v845_v4 }
 0x299   :  { %v737_v14 = vpop.f32.mrf.mxu0 }
 0x29a   :  { %790 = vst [vmem:[%s1350_s7 + $0x30] sm:$0xff] %v746_v13  ;;  %v738_v15 = vadd.f32 %v845_v4, %v737_v14 }
 0x29b   :  { %v957_v16 = vpop.f32.mrf.mxu0 }
 0x29c   :  { %788 = vst [vmem:[%s1350_s7 + $0x20] sm:$0xff] %v738_v15  ;;  %v749_v17 = vadd.f32 %v957_v16, %v845_v4 }
 0x29d   :  { %v740_v18 = vpop.f32.mrf.mxu0 }
 0x29e   :  { %791 = vst [vmem:[%s1350_s7 + $0x38] sm:$0xff] %v749_v17  ;;  %v741_v19 = vadd.f32 %v845_v4, %v740_v18 }
 0x2a0   :  { %789 = vst [vmem:[%s1350_s7 + $0x28] sm:$0xff] %v741_v19 }
 0x2a7   :  { %v960_v20 = vpop.f32.mrf.mxu1 }
 0x2a8   :  { %v762_v21 = vadd.f32 %v960_v20, %v845_v4 }
 0x2a9   :  { %v753_v22 = vpop.f32.mrf.mxu1 }
 0x2aa   :  { %794 = vst [vmem:[%s1350_s7 + $0x50] sm:$0xff] %v762_v21  ;;  %v754_v23 = vadd.f32 %v845_v4, %v753_v22 }
 0x2ab   :  { %v961_v24 = vpop.f32.mrf.mxu1 }
 0x2ac   :  { %792 = vst [vmem:[%s1350_s7 + $0x40] sm:$0xff] %v754_v23  ;;  %v765_v25 = vadd.f32 %v961_v24, %v845_v4 }
 0x2ad   :  { %v756_v26 = vpop.f32.mrf.mxu1 }
 0x2ae   :  { %795 = vst [vmem:[%s1350_s7 + $0x58] sm:$0xff] %v765_v25  ;;  %v757_v27 = vadd.f32 %v845_v4, %v756_v26 }
 0x2b0   :  { %793 = vst [vmem:[%s1350_s7 + $0x48] sm:$0xff] %v757_v27 }
 0x2b7   :  { %v964_v28 = vpop.f32.mrf.mxu1 }
 0x2b8   :  { %v778_v29 = vadd.f32 %v964_v28, %v845_v4 }
 0x2b9   :  { %v769_v30 = vpop.f32.mrf.mxu1 }
 0x2ba   :  { %798 = vst [vmem:[%s1350_s7 + $0x70] sm:$0xff] %v778_v29  ;;  %v770_v31 = vadd.f32 %v845_v4, %v769_v30 }
 0x2bb   :  { %v965_v32 = vpop.f32.mrf.mxu1 }
 0x2bc   :  { %796 = vst [vmem:[%s1350_s7 + $0x60] sm:$0xff] %v770_v31  ;;  %v781_v33 = vadd.f32 %v965_v32, %v845_v4 }
 0x2bd   :  { %v772_v34 = vpop.f32.mrf.mxu1 }
 0x2be   :  { %799 = vst [vmem:[%s1350_s7 + $0x78] sm:$0xff] %v781_v33  ;;  %v773_v35 = vadd.f32 %v845_v4, %v772_v34 }
 0x2c0   :  { %797 = vst [vmem:[%s1350_s7 + $0x68] sm:$0xff] %v773_v35 }

</bundles_post_ra>
